<compile_context>
chip_gen: v7x
topology: tpu7x:2x2x1
jax: 0.10.0
libtpu: 0.0.40
codegen_flags: <defaults>
</compile_context>

<pallas_src>
import functools

import jax
import jax.numpy as jnp
from jax import lax
from jax.experimental import pallas as pl
from jax.experimental.pallas import tpu as pltpu


def _round_up(n, m):
    return ((n + m - 1) // m) * m


def _pick_tile(n_pad, target):
    """Largest multiple of 128 that divides n_pad and is <= max(target, 128)."""
    t = min(max((target // 128) * 128, 128), n_pad)
    while n_pad % t != 0:
        t -= 128
    return t


def _self_attn_kernel(n_valid, tk,
                      gamma_ref,                 # SMEM scalar prefetch, (1,)
                      x_ref,                     # (1, C, N_pad) whole image
                      wq_ref, wk_ref, wv_ref,    # (C, C) each
                      b_ref,                     # (C, 3) stacked [bq, bk, bv]
                      o_ref,                     # (1, C, TQ) output tile
                      k_sc,                      # (C,   N_pad) bf16 scratch
                      v_sc):                     # (C+1, N_pad) bf16 scratch (ones row fused)
    qi = pl.program_id(1)
    C = wq_ref.shape[0]
    TQ = o_ref.shape[2]
    n_pad = x_ref.shape[2]
    n_kv = n_pad // tk

    # ---- once per image: project K and V (+ ones row) into persistent scratch.
    @pl.when(qi == 0)
    def _project_kv():
        x_all = x_ref[0].astype(jnp.bfloat16)                               # (C, N_pad)
        k = jnp.dot(wk_ref[...].astype(jnp.bfloat16), x_all,
                    preferred_element_type=jnp.float32) + b_ref[:, 1:2]
        v = jnp.dot(wv_ref[...].astype(jnp.bfloat16), x_all,
                    preferred_element_type=jnp.float32) + b_ref[:, 2:3]
        k_sc[...] = k.astype(k_sc.dtype)
        v_sc[0:C, :] = v.astype(v_sc.dtype)
        v_sc[C:C + 1, :] = jnp.ones((1, n_pad), dtype=v_sc.dtype)

    # ---- project this query tile (bf16 MXU inputs, f32 accumulation).
    q_off = pl.multiple_of(qi * TQ, TQ)
    x_q = x_ref[0, :, pl.ds(q_off, TQ)]                                     # (C, TQ) f32
    q = jnp.dot(wq_ref[...].astype(jnp.bfloat16), x_q.astype(jnp.bfloat16),
                preferred_element_type=jnp.float32) + b_ref[:, 0:1]         # (C, TQ) f32
    q_bf = q.astype(jnp.bfloat16)

    # ---- streaming (flash-style) attention over the VMEM-resident K/V.
    def kv_step(t, carry):
        m_prev, acc = carry                                                 # (1,TQ), (C+1,TQ)
        off = pl.multiple_of(t * tk, tk)
        k = k_sc[:, pl.ds(off, tk)]                                         # (C,   TK) bf16
        v = v_sc[:, pl.ds(off, tk)]                                         # (C+1, TK) bf16
        # energy in (key, query) layout: e[j, i] = sum_c k[c, j] * q[c, i]
        e = lax.dot_general(k, q_bf,
                            dimension_numbers=(((0,), (0,)), ((), ())),
                            preferred_element_type=jnp.float32)             # (TK, TQ)
        if n_valid != n_pad:  # mask padded key positions (static check)
            key_idx = off + lax.broadcasted_iota(jnp.int32, (tk, TQ), 0)
            e = jnp.where(key_idx < n_valid, e, -jnp.inf)
        m_new = jnp.maximum(m_prev, jnp.max(e, axis=0, keepdims=True))      # (1, TQ)
        alpha = jnp.exp(m_prev - m_new)                                     # (1, TQ)
        p = jnp.exp(e - m_new).astype(jnp.bfloat16)                         # (TK, TQ)
        # acc[c, i] += sum_j v_ext[c, j] * p[j, i]; last row accumulates sum_j p
        # (fused softmax denominator on the MXU).
        pv = lax.dot_general(v, p,
                             dimension_numbers=(((1,), (0,)), ((), ())),
                             preferred_element_type=jnp.float32)            # (C+1, TQ)
        return m_new, alpha * acc + pv

    m0 = jnp.full((1, TQ), -jnp.inf, dtype=jnp.float32)
    acc0 = jnp.zeros((C + 1, TQ), dtype=jnp.float32)
    _, acc = lax.fori_loop(0, n_kv, kv_step, (m0, acc0),
                           unroll=True if n_kv <= 8 else False)

    # ---- finalize: normalize with the fused denominator row, residual, store once.
    inv_l = pl.reciprocal(acc[C:C + 1, :], approx=True)                     # (1, TQ), EUP
    out = acc[0:C, :] * inv_l                                               # (C, TQ)
    o_ref[0] = (gamma_ref[0] * out + x_q.astype(jnp.float32)).astype(o_ref.dtype)


def self_attention(x, wq, bq, wk, bk, wv, bv, gamma, *, q_tile=512, kv_tile=1024):
    """SAGAN self-attention.  x: (B, C, H, W) NCHW.  Returns (B, C, H, W)."""
    B, C, H, W = x.shape
    N = H * W
    N_pad = _round_up(N, 128)
    TQ = _pick_tile(N_pad, q_tile)
    TK = _pick_tile(N_pad, kv_tile)

    x_flat = x.reshape(B, C, N)
    if N_pad != N:
        x_flat = jnp.pad(x_flat, ((0, 0), (0, 0), (0, N_pad - N)))

    # Stack the three 1x1-conv biases into one (C, 3) array (single VMEM block).
    b_all = jnp.stack([bq.reshape(C), bk.reshape(C), bv.reshape(C)],
                      axis=1).astype(jnp.float32)
    gamma = jnp.asarray(gamma, dtype=jnp.float32).reshape(1)

    grid = (B, N_pad // TQ)

    # VMEM footprint estimate (bytes): x block (f32, double-buffered), bf16 K/V
    # scratch, output block, weights/biases, and the (TK, TQ) energy/prob temps.
    Cp = _round_up(C, 8)
    Cl = _round_up(C, 128)
    vmem_est = (
        2 * Cp * N_pad * 4                    # x input block, double-buffered
        + Cp * N_pad * 2                      # K scratch (bf16)
        + _round_up(C + 1, 8) * N_pad * 2     # V(+ones) scratch (bf16)
        + 2 * Cp * TQ * 4                     # output block, double-buffered
        + 3 * 2 * Cp * Cl * 4                 # weight blocks
        + 2 * Cp * 128 * 4                    # bias block
        + 4 * TK * TQ * 4                     # e / p / mask temporaries
        + 4 * (Cp + 8) * TQ * 4               # q / acc temporaries
    )
    try:  # per-core VMEM capacity (128 MiB v5e/v6e, 64 MiB v7x); safe fallback.
        vmem_cap = int(getattr(pltpu.get_tpu_info(), "vmem_capacity_bytes",
                               64 * 1024 * 1024))
    except Exception:
        vmem_cap = 64 * 1024 * 1024
    vmem_limit = int(min(max(2 * vmem_est, 32 * 1024 * 1024),
                         vmem_cap - 4 * 1024 * 1024, 100 * 1024 * 1024))
    # TODO(synk): if 2*vmem_est still exceeds the cap (very large C*N), tile K/V
    # over the image instead of holding whole-image K/V scratch.

    out_flat = pl.pallas_call(
        functools.partial(_self_attn_kernel, N, TK),
        out_shape=jax.ShapeDtypeStruct((B, C, N_pad), x.dtype),
        grid_spec=pltpu.PrefetchScalarGridSpec(
            num_scalar_prefetch=1,                       # gamma -> SMEM
            grid=grid,
            in_specs=[
                # Whole-image x: block index depends only on b, so Pallas DMAs
                # it from HBM once per image (no re-fetch across query tiles).
                pl.BlockSpec((1, C, N_pad), lambda b, qi, g: (b, 0, 0)),
                pl.BlockSpec((C, C), lambda b, qi, g: (0, 0)),   # wq
                pl.BlockSpec((C, C), lambda b, qi, g: (0, 0)),   # wk
                pl.BlockSpec((C, C), lambda b, qi, g: (0, 0)),   # wv
                pl.BlockSpec((C, 3), lambda b, qi, g: (0, 0)),   # biases
            ],
            out_specs=pl.BlockSpec((1, C, TQ), lambda b, qi, g: (b, 0, qi)),
            scratch_shapes=[
                pltpu.VMEM((C, N_pad), jnp.bfloat16),      # K (whole image)
                pltpu.VMEM((C + 1, N_pad), jnp.bfloat16),  # V (+ ones row)
            ],
        ),
        compiler_params=pltpu.CompilerParams(
            # K/V scratch filled at qi == 0 is reused by the remaining query
            # tiles of the same image, so the qi axis must stay sequential per
            # core; the batch axis carries the cross-core parallelism.
            # TODO(synk): for v7x with B < num TensorCores, project K/V outside
            # the kernel (plain XLA GEMM) and mark the qi axis "parallel".
            dimension_semantics=("parallel", "arbitrary"),
            vmem_limit_bytes=vmem_limit,
        ),
    )(gamma, x_flat, wq, wk, wv, b_all)

    if N_pad != N:
        out_flat = out_flat[:, :, :N]
    return out_flat.reshape(B, C, H, W)


def _spectral_normalize(w):
    # Mimic SpectralNorm: divide the weight by its largest singular value.
    s = jnp.linalg.svd(w, compute_uv=False)[0]
    return w / s


def _reference(x, wq, bq, wk, bk, wv, bv, gamma):
    B, C, H, W = x.shape
    N = H * W
    xf = x.reshape(B, C, N)
    q = jnp.einsum('oc,bcn->bon', wq, xf) + bq.reshape(1, C, 1)
    k = jnp.einsum('oc,bcn->bon', wk, xf) + bk.reshape(1, C, 1)
    v = jnp.einsum('oc,bcn->bon', wv, xf) + bv.reshape(1, C, 1)
    energy = jnp.einsum('bci,bcj->bij', q, k)           # proj_query @ proj_key
    attn = jax.nn.softmax(energy, axis=-1)
    out = jnp.einsum('bcj,bij->bci', v, attn)           # v @ attn^T
    out = gamma[0] * out + xf
    return out.reshape(B, C, H, W)


if __name__ == "__main__":
    key = jax.random.PRNGKey(0)
    B, C, H, W = 2, 4, 16, 16

    k_x, k_wq, k_bq, k_wk, k_bk, k_wv, k_bv = jax.random.split(key, 7)
    x = jax.random.normal(k_x, (B, C, H, W), dtype=jnp.float32)

    # Conv2d(in_dim, in_dim, kernel_size=1) weights -> (C, C), biases -> (C,)
    wq = _spectral_normalize(jax.random.normal(k_wq, (C, C), dtype=jnp.float32) * 0.5)
    wk = _spectral_normalize(jax.random.normal(k_wk, (C, C), dtype=jnp.float32) * 0.5)
    wv = _spectral_normalize(jax.random.normal(k_wv, (C, C), dtype=jnp.float32) * 0.5)
    bq = jax.random.normal(k_bq, (C,), dtype=jnp.float32) * 0.1
    bk = jax.random.normal(k_bk, (C,), dtype=jnp.float32) * 0.1
    bv = jax.random.normal(k_bv, (C,), dtype=jnp.float32) * 0.1

    # gamma is initialized to zero in the PyTorch module (out == x at init);
    # use a nonzero value here so the attention path is actually exercised.
    gamma = jnp.array([0.5], dtype=jnp.float32)

    out = self_attention(x, wq, bq, wk, bk, wv, bv, gamma)
    out = jax.block_until_ready(out)

    ref = _reference(x, wq, bq, wk, bk, wv, bv, gamma)
    assert out.shape == (B, C, H, W)
    # Tolerance accounts for bf16 QK^T / PV / projections + EUP approx reciprocal.
    err = float(jnp.max(jnp.abs(out - ref)))
    assert jnp.allclose(out, ref, atol=3e-2, rtol=3e-2), \
        f"mismatch vs reference (max abs err={err})"

    print("KERNEL_OK")
</pallas_src>

<mosaic_0001>
module attributes {stable_mosaic.version = 11 : i64} {
  func.func @_self_attn_kernel(%arg0: i32, %arg1: i32, %arg2: memref<1xf32, #tpu.memory_space<smem>>, %arg3: memref<1x4x256xf32, #tpu.memory_space<vmem>>, %arg4: memref<4x4xf32, #tpu.memory_space<vmem>>, %arg5: memref<4x4xf32, #tpu.memory_space<vmem>>, %arg6: memref<4x4xf32, #tpu.memory_space<vmem>>, %arg7: memref<4x3xf32, #tpu.memory_space<vmem>>, %arg8: memref<1x4x256xf32, #tpu.memory_space<vmem>>, %arg9: memref<4x256xbf16, #tpu.memory_space<vmem>>, %arg10: memref<5x256xbf16, #tpu.memory_space<vmem>>) attributes {dimension_semantics = [#tpu.dimension_semantics<parallel>, #tpu.dimension_semantics<arbitrary>], iteration_bounds = array<i64: 2, 1>, scalar_prefetch = 1 : i64, scratch_operands = 2 : i64, tpu.core_type = #tpu.core_type<tc>, window_params = [{transform_indices = @transform_0, window_bounds = array<i64: 1, 4, 256>}, {pipeline_mode = #tpu.pipeline_mode<synchronous>, transform_indices = @transform_1, window_bounds = array<i64: 4, 4>}, {pipeline_mode = #tpu.pipeline_mode<synchronous>, transform_indices = @transform_2, window_bounds = array<i64: 4, 4>}, {pipeline_mode = #tpu.pipeline_mode<synchronous>, transform_indices = @transform_3, window_bounds = array<i64: 4, 4>}, {pipeline_mode = #tpu.pipeline_mode<synchronous>, transform_indices = @transform_4, window_bounds = array<i64: 4, 3>}, {transform_indices = @transform_5, window_bounds = array<i64: 1, 4, 256>}]} {
    %c0_i32 = arith.constant 0 : i32
    %0 = arith.cmpi eq, %arg1, %c0_i32 : i32
    %1 = arith.extui %0 : i1 to i32
    %c0_i32_0 = arith.constant 0 : i32
    %2 = arith.cmpi ne, %1, %c0_i32_0 : i32
    scf.if %2 {
      %c0_19 = arith.constant 0 : index
      %c0_20 = arith.constant 0 : index
      %c0_21 = arith.constant 0 : index
      %50 = vector.load %arg3[%c0_19, %c0_20, %c0_21] : memref<1x4x256xf32, #tpu.memory_space<vmem>>, vector<1x4x256xf32>
      %51 = vector.shape_cast %50 : vector<1x4x256xf32> to vector<4x256xf32>
      %52 = arith.truncf %51 : vector<4x256xf32> to vector<4x256xbf16>
      %c0_22 = arith.constant 0 : index
      %c0_23 = arith.constant 0 : index
      %53 = vector.load %arg5[%c0_22, %c0_23] : memref<4x4xf32, #tpu.memory_space<vmem>>, vector<4x4xf32>
      %54 = arith.truncf %53 : vector<4x4xf32> to vector<4x4xbf16>
      %cst_24 = arith.constant dense<0.000000e+00> : vector<4x256xf32>
      %55 = tpu.matmul %54, %52, %cst_24 {dimension_numbers = #tpu.dot_dimension_numbers<[1], [0], [0], [1], [0, 0, 1, 1], [], []>} : vector<4x4xbf16>, vector<4x256xbf16>, vector<4x256xf32> -> vector<4x256xf32>
      %c0_25 = arith.constant 0 : index
      %c1 = arith.constant 1 : index
      %56 = vector.load %arg7[%c0_25, %c1] : memref<4x3xf32, #tpu.memory_space<vmem>>, vector<4x1xf32>
      %57 = vector.broadcast %56 : vector<4x1xf32> to vector<4x256xf32>
      %58 = arith.addf %55, %57 : vector<4x256xf32>
      %c0_26 = arith.constant 0 : index
      %c0_27 = arith.constant 0 : index
      %59 = vector.load %arg6[%c0_26, %c0_27] : memref<4x4xf32, #tpu.memory_space<vmem>>, vector<4x4xf32>
      %60 = arith.truncf %59 : vector<4x4xf32> to vector<4x4xbf16>
      %cst_28 = arith.constant dense<0.000000e+00> : vector<4x256xf32>
      %61 = tpu.matmul %60, %52, %cst_28 {dimension_numbers = #tpu.dot_dimension_numbers<[1], [0], [0], [1], [0, 0, 1, 1], [], []>} : vector<4x4xbf16>, vector<4x256xbf16>, vector<4x256xf32> -> vector<4x256xf32>
      %c0_29 = arith.constant 0 : index
      %c2 = arith.constant 2 : index
      %62 = vector.load %arg7[%c0_29, %c2] : memref<4x3xf32, #tpu.memory_space<vmem>>, vector<4x1xf32>
      %63 = vector.broadcast %62 : vector<4x1xf32> to vector<4x256xf32>
      %64 = arith.addf %61, %63 : vector<4x256xf32>
      %65 = arith.truncf %58 : vector<4x256xf32> to vector<4x256xbf16>
      %c0_30 = arith.constant 0 : index
      %c0_31 = arith.constant 0 : index
      %66 = vector.load %arg9[%c0_30, %c0_31] : memref<4x256xbf16, #tpu.memory_space<vmem>>, vector<4x256xbf16>
      tpu.vector_store %arg9[%c0_30, %c0_31], %65 {strides = array<i32>} : memref<4x256xbf16, #tpu.memory_space<vmem>>, vector<4x256xbf16>,
      %67 = arith.truncf %64 : vector<4x256xf32> to vector<4x256xbf16>
      %c0_32 = arith.constant 0 : index
      %c0_33 = arith.constant 0 : index
      %68 = vector.load %arg10[%c0_32, %c0_33] : memref<5x256xbf16, #tpu.memory_space<vmem>>, vector<4x256xbf16>
      tpu.vector_store %arg10[%c0_32, %c0_33], %67 {strides = array<i32>} : memref<5x256xbf16, #tpu.memory_space<vmem>>, vector<4x256xbf16>,
      %cst_34 = arith.constant 1.000000e+00 : bf16
      %69 = vector.broadcast %cst_34 : bf16 to vector<1x256xbf16>
      %c4 = arith.constant 4 : index
      %c0_35 = arith.constant 0 : index
      %70 = vector.load %arg10[%c4, %c0_35] : memref<5x256xbf16, #tpu.memory_space<vmem>>, vector<1x256xbf16>
      tpu.vector_store %arg10[%c4, %c0_35], %69 {strides = array<i32>} : memref<5x256xbf16, #tpu.memory_space<vmem>>, vector<1x256xbf16>,
    } else {
    }
    %c256_i32 = arith.constant 256 : i32
    %3 = arith.muli %arg1, %c256_i32 : i32
    %4 = tpu.assume_multiple %3, 256 : i32
    %c0 = arith.constant 0 : index
    %c0_1 = arith.constant 0 : index
    %5 = arith.index_cast %4 : i32 to index
    %6 = vector.load %arg3[%c0, %c0_1, %5] : memref<1x4x256xf32, #tpu.memory_space<vmem>>, vector<1x4x256xf32>
    %7 = vector.shape_cast %6 : vector<1x4x256xf32> to vector<4x256xf32>
    %c0_2 = arith.constant 0 : index
    %c0_3 = arith.constant 0 : index
    %8 = vector.load %arg4[%c0_2, %c0_3] : memref<4x4xf32, #tpu.memory_space<vmem>>, vector<4x4xf32>
    %9 = arith.truncf %8 : vector<4x4xf32> to vector<4x4xbf16>
    %10 = arith.truncf %7 : vector<4x256xf32> to vector<4x256xbf16>
    %cst = arith.constant dense<0.000000e+00> : vector<4x256xf32>
    %11 = tpu.matmul %9, %10, %cst {dimension_numbers = #tpu.dot_dimension_numbers<[1], [0], [0], [1], [0, 0, 1, 1], [], []>} : vector<4x4xbf16>, vector<4x256xbf16>, vector<4x256xf32> -> vector<4x256xf32>
    %c0_4 = arith.constant 0 : index
    %c0_5 = arith.constant 0 : index
    %12 = vector.load %arg7[%c0_4, %c0_5] : memref<4x3xf32, #tpu.memory_space<vmem>>, vector<4x1xf32>
    %13 = vector.broadcast %12 : vector<4x1xf32> to vector<4x256xf32>
    %14 = arith.addf %11, %13 : vector<4x256xf32>
    %15 = arith.truncf %14 : vector<4x256xf32> to vector<4x256xbf16>
    %cst_6 = arith.constant 0xFF800000 : f32
    %16 = vector.broadcast %cst_6 : f32 to vector<1x256xf32>
    %cst_7 = arith.constant 0.000000e+00 : f32
    %17 = vector.broadcast %cst_7 : f32 to vector<5x256xf32>
    %c0_i32_8 = arith.constant 0 : i32
    %c256_i32_9 = arith.constant 256 : i32
    %18 = arith.muli %c0_i32_8, %c256_i32_9 : i32
    %19 = tpu.assume_multiple %18, 256 : i32
    %c0_10 = arith.constant 0 : index
    %20 = arith.index_cast %19 : i32 to index
    %21 = vector.load %arg9[%c0_10, %20] : memref<4x256xbf16, #tpu.memory_space<vmem>>, vector<4x256xbf16>
    %c0_11 = arith.constant 0 : index
    %22 = arith.index_cast %19 : i32 to index
    %23 = vector.load %arg10[%c0_11, %22] : memref<5x256xbf16, #tpu.memory_space<vmem>>, vector<5x256xbf16>
    %cst_12 = arith.constant dense<0.000000e+00> : vector<256x256xf32>
    %24 = tpu.matmul %21, %15, %cst_12 {dimension_numbers = #tpu.dot_dimension_numbers<[0], [0], [1], [1], [0, 1, 1, 1], [], []>} : vector<4x256xbf16>, vector<4x256xbf16>, vector<256x256xf32> -> vector<256x256xf32>
    %cst_13 = arith.constant dense<0xFF800000> : vector<256xf32>
    %25 = vector.multi_reduction <maximumf>, %24, %cst_13 [0] : vector<256x256xf32> to vector<256xf32>
    %26 = vector.shape_cast %25 : vector<256xf32> to vector<1x256xf32>
    %27 = arith.maximumf %16, %26 : vector<1x256xf32>
    %28 = arith.subf %16, %27 : vector<1x256xf32>
    %29 = math.exp %28 : vector<1x256xf32>
    %30 = vector.broadcast %27 : vector<1x256xf32> to vector<256x256xf32>
    %31 = arith.subf %24, %30 : vector<256x256xf32>
    %32 = math.exp %31 : vector<256x256xf32>
    %33 = arith.truncf %32 : vector<256x256xf32> to vector<256x256xbf16>
    %cst_14 = arith.constant dense<0.000000e+00> : vector<5x256xf32>
    %34 = tpu.matmul %23, %33, %cst_14 {dimension_numbers = #tpu.dot_dimension_numbers<[1], [0], [0], [1], [0, 0, 1, 1], [], []>} : vector<5x256xbf16>, vector<256x256xbf16>, vector<5x256xf32> -> vector<5x256xf32>
    %35 = vector.broadcast %29 : vector<1x256xf32> to vector<5x256xf32>
    %36 = arith.mulf %35, %17 : vector<5x256xf32>
    %37 = arith.addf %36, %34 : vector<5x256xf32>
    %c1_i32 = arith.constant 1 : i32
    %38 = vector.extract_strided_slice %37 {offsets = [4, 0], sizes = [1, 256], strides = [1, 1]} : vector<5x256xf32> to vector<1x256xf32>
    %39 = tpu.reciprocal %38 {approx = true} : vector<1x256xf32> -> vector<1x256xf32>
    %40 = vector.extract_strided_slice %37 {offsets = [0, 0], sizes = [4, 256], strides = [1, 1]} : vector<5x256xf32> to vector<4x256xf32>
    %41 = vector.broadcast %39 : vector<1x256xf32> to vector<4x256xf32>
    %42 = arith.mulf %40, %41 : vector<4x256xf32>
    %c0_15 = arith.constant 0 : index
    %43 = memref.load %arg2[%c0_15] : memref<1xf32, #tpu.memory_space<smem>>
    %44 = vector.broadcast %43 : f32 to vector<4x256xf32>
    %45 = arith.mulf %44, %42 : vector<4x256xf32>
    %46 = arith.addf %45, %7 : vector<4x256xf32>
    %c0_16 = arith.constant 0 : index
    %c0_17 = arith.constant 0 : index
    %c0_18 = arith.constant 0 : index
    %47 = vector.load %arg8[%c0_16, %c0_17, %c0_18] : memref<1x4x256xf32, #tpu.memory_space<vmem>>, vector<1x4x256xf32>
    %48 = vector.shape_cast %47 : vector<1x4x256xf32> to vector<4x256xf32>
    %49 = vector.shape_cast %46 : vector<4x256xf32> to vector<1x4x256xf32>
    tpu.vector_store %arg8[%c0_16, %c0_17, %c0_18], %49 {strides = array<i32>} : memref<1x4x256xf32, #tpu.memory_space<vmem>>, vector<1x4x256xf32>,
    return
  }
  func.func @transform_0(%arg0: i32, %arg1: i32, %arg2: memref<1xf32, #tpu.memory_space<smem>>) -> (i32, i32, i32) {
    %c0_i32 = arith.constant 0 : i32
    %c0_i32_0 = arith.constant 0 : i32
    %c0_i32_1 = arith.constant 0 : i32
    return %arg0, %c0_i32, %c0_i32_0 : i32, i32, i32
  }
  func.func @transform_1(%arg0: i32, %arg1: i32, %arg2: memref<1xf32, #tpu.memory_space<smem>>) -> (i32, i32) {
    %c0_i32 = arith.constant 0 : i32
    %c0_i32_0 = arith.constant 0 : i32
    %c0_i32_1 = arith.constant 0 : i32
    return %c0_i32, %c0_i32_0 : i32, i32
  }
  func.func @transform_2(%arg0: i32, %arg1: i32, %arg2: memref<1xf32, #tpu.memory_space<smem>>) -> (i32, i32) {
    %c0_i32 = arith.constant 0 : i32
    %c0_i32_0 = arith.constant 0 : i32
    %c0_i32_1 = arith.constant 0 : i32
    return %c0_i32, %c0_i32_0 : i32, i32
  }
  func.func @transform_3(%arg0: i32, %arg1: i32, %arg2: memref<1xf32, #tpu.memory_space<smem>>) -> (i32, i32) {
    %c0_i32 = arith.constant 0 : i32
    %c0_i32_0 = arith.constant 0 : i32
    %c0_i32_1 = arith.constant 0 : i32
    return %c0_i32, %c0_i32_0 : i32, i32
  }
  func.func @transform_4(%arg0: i32, %arg1: i32, %arg2: memref<1xf32, #tpu.memory_space<smem>>) -> (i32, i32) {
    %c0_i32 = arith.constant 0 : i32
    %c0_i32_0 = arith.constant 0 : i32
    %c0_i32_1 = arith.constant 0 : i32
    return %c0_i32, %c0_i32_0 : i32, i32
  }
  func.func @transform_5(%arg0: i32, %arg1: i32, %arg2: memref<1xf32, #tpu.memory_space<smem>>) -> (i32, i32, i32) {
    %c0_i32 = arith.constant 0 : i32
    %c0_i32_0 = arith.constant 0 : i32
    return %arg0, %c0_i32, %arg1 : i32, i32, i32
  }
}

</mosaic_0001>

<bundles_post_ra>
// kernel: tpu_custom_call.1
= control target key start
LH: loop header
LB: loop body
LE: loop exit
PB: predicated region body
PF: predicated region fallthrough
CT: control target
= control target key end

     0   :  { %s2436_s0 = inlined_call_operand.<no memory space> [shape: f32[1], index: 0, kind: input, shape index: {}]   ;;  %s2437_s1 = inlined_call_operand.hbm [shape: f32[2,4,256], index: 1, kind: input, shape index: {}]   ;;  %s2438_s2 = inlined_call_operand.vmem [shape: f32[4,4], index: 2, kind: input, shape index: {}]   ;;  %s2439_s3 = inlined_call_operand.vmem [shape: f32[4,4], index: 3, kind: input, shape index: {}]   ;;  %s2440_s4 = inlined_call_operand.vmem [shape: f32[4,4], index: 4, kind: input, shape index: {}]   ;;  %s2441_s5 = inlined_call_operand.vmem [shape: f32[4,3], index: 5, kind: input, shape index: {}]   ;;  %s2442_s6 = inlined_call_operand.hbm [shape: f32[2,4,256], index: 6, kind: output, shape index: {}]  }
   0x1   :  { %11 = sst [smem:[#allocation5]] %s2436_s0 }
   0x2   :  { %12 = vsyncpa [#allocation7], 0 }
   0x3   :  { %14 = vsyncpa [#allocation7 + $0x1], 0 }
   0x4   :  { %15 = vsyncpa [#allocation8], 0 }
   0x5   :  { %17 = vsyncpa [#allocation8 + $0x1], 0  ;;  %s1671_s23 = smov 0   ;;  %s1673_s24 = smov 0  }
   0x6   :  { %s1675_s25 = smov 0   ;;  %s1677_s26 = smov 0  }
   0x7   :  { %s1679_s27 = smov 0   ;;  %s1681_s28 = smov 0  }
   0x8 LB: > { %s1257_s0 = sadd.s32 4294967295, %s1626_s28   ;;  %s1258_s29 = sadd.s32 4294967294, %s1626_s28   ;;  %s1626_s28 = sphi %s1681_s28, %s23_s28   ;;  %s1622_s27 = sphi %s1679_s27, %s2623_s27   ;;  %s1618_s26 = sphi %s1677_s26, %s2622_s26   ;;  %s1614_s25 = sphi %s1675_s25, %s2621_s25   ;;  %s1610_s24 = sphi %s1673_s24, %s2620_s24   ;;  %s1606_s23 = sphi %s1671_s23, %s2619_s23  }
   0x9   : > { %s35_s30 = sadd.s32 1, %s1622_s27  ;;  %s42_s7 = sadd.s32 1, %s1614_s25 }
   0xa   : > { %p37_p0 = scmp.ge.s32.totalorder %s35_s30, 2  ;;  %p49_p1 = scmp.ne.s32.totalorder %s1614_s25, %s1610_s24 }
   0xb   : > { %p50_p2 = scmp.eq.s32.totalorder %s1626_s28, 0  ;;  %p55_p3 = scmp.ne.s32.totalorder %s1610_s24, %s1606_s23 }
   0xc   : > { %s2625_s30 = smov (%p37_p0, %s35_s30), 0  ;;  %p56_p5 = scmp.eq.s32.totalorder %s1257_s0, 0 }
   0xd   : > { %p1712_p4 = por %p50_p2, %p49_p1  ;;  %s39_s9 = ssub.s32 %s1622_s27, %s2625_s30 }
   0xe   : > { %p165_p6 = scmp.eq.s32.totalorder %s1257_s0, 1  ;;  %p40_p7 = scmp.eq.s32.totalorder %s39_s9, 0 }
   0xf   : > { %p1718_p8 = por %p56_p5, %p55_p3  ;;  %p171_p10 = scmp.eq.s32.totalorder %s1258_s29, 1 }
  0x10   : > { %p1722_p9 = por %p165_p6, %p49_p1  ;;  %p1316_p13 = scmp.lt.s32.totalorder %s1626_s28, 2 }
  0x11   : > { %s1727_s12 = scalar_select %p40_p7, %s1614_s25, %s42_s7  }
  0x12   : > { %s2495_s11 = scalar_select %p1722_p9, 1, 0 }
  0x13   : > { %p1729_p11 = por %p171_p10, %p55_p3  ;;  %s203_s14 = sand.u32 1, %s1614_s25  }
  0x14   : > { %s1261_s15 = sshll.u32 %s203_s14, 3  ;;  %s1301_s16 = sshll.u32 %s1622_s27, 7 }
  0x15   : > { %s2496_s13 = scalar_select %p1729_p11, 1, 0 }
  0x16   : > { %s1740_s19 = scalar_lea.hbm %s2437_s1, %s1301_s16  ;;  %s207_s20 = scalar_lea.vmem [#allocation6], %s1261_s15 }
  0x17   : > { %s215_s21 = sshll.u32 %s207_s20, 4  ;;  %p1746_p0 = pnand %p1316_p13, %p1712_p4  ;;  %s1742_s21 = int_to_ptr.vmem [resolvable:$true] %s215_s21 }
  0x18   : > { %s204_s0 = scalar_lea.sflag [#allocation7], %s203_s14  ;;  %s1514_s29 = scalar_lea.hbm %s1740_s19, 128 }
  0x19   : > { %p1515_p3 = scmp.ne.s32.totalorder %s1740_s19, %s1514_s29  ;;  %p1516_p5 = pneg %p1746_p0 }
  0x1a   : > { %s1519_s8 = scalar_lea.hbm %s2437_s1, 256  ;;  %p1520_p4 = scmp.lt.u32.totalorder %s1740_s19, %s2437_s1 }
  0x1b   : > { %p1517_p6 = pnand %p1516_p5, %p1515_p3  ;;  %p1521_p10 = scmp.lt.u32.totalorder %s1519_s8, %s1514_s29 }
  0x1c   : > { %p1523_p12 = scmp.lt.u32.totalorder %s1514_s29, %s1740_s19 }
  0x1d   : > { %p1518_p7 = pneg %p1517_p6  ;;  %p1522_p13 = por %p1521_p10, %p1520_p4 }
  0x1f   : > { %p1524_p1 = por %p1523_p12, %p1522_p13 }
  0x21   : > { %p1525_p2 = pnand %p1524_p1, %p1518_p7 }
  0x23   : > { %1528 = shalt.err (!%p1525_p2)
}
  0x24   : > { %s1529_s14 = scalar_lea.vmem %s1742_s21, 128  ;;  %s1628_s17 = smov [#allocation6]  }
  0x25   : > { %p1530_p3 = scmp.ne.s32.totalorder %s1742_s21, %s1529_s14  ;;  %s1534_s18 = sshll.u32 %s1628_s17, 4  ;;  %s1535_s18 = int_to_ptr.vmem [resolvable:$false] %s1534_s18 }
  0x26   : > { %s1536_s20 = scalar_lea.vmem %s1535_s18, 256  ;;  %p1537_p9 = scmp.lt.s32.totalorder %s1742_s21, %s1535_s18 }
  0x27   : > { %p1532_p6 = pnand %p1530_p3, %p1516_p5  ;;  %p1538_p4 = scmp.lt.s32.totalorder %s1536_s20, %s1529_s14 }
  0x29   : > { %p1533_p11 = pneg %p1532_p6  ;;  %p1539_p10 = por %p1538_p4, %p1537_p9 }
  0x2b   : > { %p1540_p12 = pnand %p1539_p10, %p1533_p11 }
  0x2d   : > { %1543 = shalt.err (!%p1540_p12)
}
  0x2e   : > { %1311 = dma.hbm_to_vmem [thread:$0]  (!%p1746_p0), %s1740_s19, 128, %s1742_s21, %s204_s0  }
  0x2f   : > { %p2498_p1 = scmp.lt.s32.totalorder %s1626_s28, 3  ;;  %p2499_p2 = scmp.ge.s32.totalorder %s1626_s28, 1 }
  0x31   : > { %p221_p5 = pnand %p2499_p2, %p2498_p1 }
  0x33   : > { %224 = sbr.rel (%p221_p5) target bundleno = 1093 (0x445), region = 40 }
  0x3a   : > { %s1782_s29 = sand.u32 1, %s1610_s24  }
  0x3b   : > { %s1265_s7 = sshll.u32 %s1782_s29, 3  ;;  %s227_s9 = scalar_lea.sflag [#allocation7], %s1782_s29 }
  0x3c   : > { %s1788_s22 = scalar_lea.vmem [#allocation6], %s1265_s7 }
  0x3d   : > { %1597 = dma.done.wait (%p1718_p8), %s227_s9, 128  }
  0x3e   : > { %1599 = vsyncadd (%p1718_p8), %s227_s9, 4294967168  ;;  %v1629_v0 = vmov 0   ;;  %v1630_v1 = vmov 1   ;;  %v264_v2 = vld [vmem:[%s1788_s22] sm:$0xff]  ;;  %vm282_vm0 = vcmask 1041408   ;;  %vm278_vm1 = vcmask 31744  }
  0x3f   : > { %321 = vmatprep.mubr.bf16.mxu0 %v1629_v0  ;;  %1369 = vset.pattern.permute.xlu0 %v1630_v1  ;;  %v272_v3 = vld [vmem:[%s2441_s5] sm:$0xf]  ;;  %v1800_v4 = vcombine.high %v264_v2, %v264_v2  ;;  %v268_v5 = vpack.c.bf16 %v264_v2, %v264_v2  ;;  %v1631_v12 = vmov 2   ;;  %vm403_vm2 = vcmask 1042434   ;;  %v410_v16 = vld [vmem:[#allocation3] sm:$0x44] }
  0x40   : > { %617 = vmatprep.mubr.bf16.mxu1 %v1629_v0  ;;  %275 = vperm.xlu0 %1369, %v272_v3   ;;  %v270_v6 = vld [vmem:[%s2439_s3] sm:$0xf]  ;;  %vm404_vm3 = vsmask.f32 2304  ;;  %vm406_vm4 = vcmask 1046534   ;;  %s1146_s20 = sld [smem:[#allocation5]] }
  0x41   : > { %2500 = vst [vmem:[#allocation12_spill] sm:$0xff] %v1800_v4  ;;  %v269_v7 = vpack.c.bf16 %v1800_v4, %v1800_v4  ;;  %v284_v8 = vsel %vm282_vm0, %v268_v5, 0  ;;  %v426_v9 = vld [vmem:[%s2441_s5] sm:$0xf]  ;;  %v271_v10 = vpack.c.bf16 %v270_v6, %v270_v6  ;;  %vm407_vm5 = vsmask.f32 6400  ;;  %vm405_vm6 = vmand %vm403_vm2, %vm404_vm3 }
  0x42   : > { %v330_v11 = vld [vmem:[%s2440_s4] sm:$0xf]  ;;  %vm408_vm7 = vmand %vm406_vm4, %vm407_vm5  ;;  %s1303_s9 = sshll.u32 %s1618_s26, 7  ;;  %s256_s19 = scalar_lea.vmem [#allocation9], %s1265_s7 }
  0x43   : > { %1267 = vmatprep.subr.msk.bf16.mxu0 %vm282_vm0, %v269_v7  ;;  %v331_v13 = vpack.c.bf16 %v330_v11, %v330_v11  ;;  %v419_v14 = vld [vmem:[%s2438_s2] sm:$0xf]  ;;  %vm409_vm8 = vmor %vm408_vm7, %vm405_vm6  ;;  %s1174_s21 = sshll.u32 %s256_s19, 4  ;;  %s2387_s8 = scalar_lea.hbm %s2442_s6, %s1303_s9  ;;  %s2389_s21 = int_to_ptr.vmem [resolvable:$true] %s1174_s21 }
  0x44   : > { %1370 = vset.pattern.permute.xlu0 %v1629_v0  ;;  %290 = vmatpush1.bf16.msra.mxu0 %v284_v8  ;;  %v420_v15 = vpack.c.bf16 %v419_v14, %v419_v14  ;;  %v411_v17 = vsel %vm409_vm8, 1065369472, %v410_v16  ;;  %s1544_s15 = scalar_lea.vmem %s2389_s21, 128  ;;  %p2616_p9 = scmp.ne.s32.totalorder %s2495_s11, 0 }
  0x45   : > { %429 = vperm.xlu0 %1370, %v426_v9   ;;  %1269 = vmatprep.subr.msk.bf16.mxu0 %vm282_vm0, %v269_v7  ;;  %412 = vst [vmem:[#allocation3] sm:$0x44] %v411_v17  ;;  %p1545_p8 = scmp.ne.s32.totalorder %s2389_s21, %s1544_s15  ;;  %s1632_s26 = smov [#allocation9]  }
  0x46   : > { %s1548_s7 = sshll.u32 %s1632_s26, 4  ;;  %s1549_s7 = int_to_ptr.vmem [resolvable:$false] %s1548_s7 }
  0x47   : > { %1268 = vmatmul.mubr.msk.bf16.vlgmr.msra.gmra.mrb[0].mxu0 %vm278_vm1, %v271_v10  ;;  %p1546_p11 = pnand %p1545_p8, %p2616_p9  ;;  %s1550_s16 = scalar_lea.vmem %s1549_s7, 256 }
  0x48   : > { %340 = vmatpush1.bf16.msra.mxu0 %v284_v8  ;;  %371 = vmatprep.mubr.bf16.mxu0 %v1629_v0  ;;  %p1551_p7 = scmp.lt.s32.totalorder %s2389_s21, %s1549_s7  ;;  %p1552_p13 = scmp.lt.s32.totalorder %s1550_s16, %s1544_s15 }
  0x49   : > { %1274 = vmatprep.subr.msk.bf16.mxu0 %vm282_vm0, %v269_v7  ;;  %1371 = vset.pattern.permute.xlu0 %v1631_v12  ;;  %p1547_p0 = pneg %p1546_p11 }
  0x4a   : > { %333 = vperm.xlu0 %1371, %v272_v3   ;;  %p1553_p3 = por %p1552_p13, %p1551_p7 }
  0x4c   : > { %p1554_p6 = pnand %p1553_p3, %p1547_p0 }
  0x4e   : > { %1372 = vset.pattern.permute.xlu0 %v1629_v0 }
  0x4f   : > { %1270 = vmatmul.mubr.msk.bf16.vlgmr.msra.gmra.mrb[4].mxu0 %vm278_vm1, %v331_v13 }
  0x50   : > { %444 = vmatpush1.bf16.msra.mxu0 %v284_v8  ;;  %475 = vmatprep.mubr.bf16.mxu0 %v1629_v0 }
  0x57   : > { %1275 = vmatmul.mubr.msk.bf16.vlgmr.msra.gmra.mrb[8].mxu0 %vm278_vm1, %v420_v15 }
  0xbf   : > { %v276_v18 = vpop.permute.xlu0 %275 }
  0xc4   : > { %v430_v20 = vpop.permute.xlu0 %429 }
  0xc9   : > { %v334_v27 = vpop.permute.xlu0 %333 }
 0x11a   : > { %v323_v19 = vpop.f32.mrb[0].mxu0 }
 0x11b   : > { %v324_v21 = vadd.f32 %v323_v19, %v276_v18  ;;  %v325_v22 = vpop.f32.mrb[1].mxu0 }
 0x11c   : > { %v326_v23 = vadd.f32 %v325_v22, %v276_v18  ;;  %v327_v24 = vpop.f32.mrb[2].mxu0 }
 0x11d   : > { %v328_v25 = vpop.f32.mrb[3].mxu0 }
 0x11e   : > { %v1271_v26 = vpack.c.bf16 %v326_v23, %v324_v21 }
 0x120   : > { %1272 = vst.sshfl [vmem:[#allocation2] sm:$0x33 pattern:$0x76325410] %v1271_v26 }
 0x122   : > { %v373_v28 = vpop.f32.mrb[4].mxu0 }
 0x123   : > { %v375_v29 = vpop.f32.mrb[5].mxu0  ;;  %v374_v30 = vadd.f32 %v373_v28, %v334_v27 }
 0x124   : > { %v377_v31 = vpop.f32.mrb[6].mxu0  ;;  %v376_v32 = vadd.f32 %v375_v29, %v334_v27 }
 0x125   : > { %v378_v33 = vpop.f32.mrb[7].mxu0 }
 0x126   : > { %v1302_v34 = vpack.c.bf16 %v376_v32, %v374_v30 }
 0x127   : > { %v1276_v35 = vld.sshfl [vmem:[#allocation2] sm:$0x33 pattern:$0x76325410] }
 0x128   : > { %499 = vxpose.xlu1.c.b16.start.end [1/1] (short) %v1276_v35, 128  ;;  %402 = vst [vmem:[#allocation3] sm:$0x33] %v1302_v34  ;;  %v496_v47 = vcombine.high %v1276_v35, %v1276_v35 }
 0x12a   : > { %v477_v36 = vpop.f32.mrb[8].mxu0 }
 0x12b   : > { %v478_v37 = vadd.f32 %v477_v36, %v430_v20  ;;  %v479_v38 = vpop.f32.mrb[9].mxu0 }
 0x12c   : > { %v480_v39 = vadd.f32 %v479_v38, %v430_v20  ;;  %v481_v40 = vpop.f32.mrb[10].mxu0 }
 0x12d   : > { %v484_v41 = vpack.c.bf16 %v478_v37, %v478_v37  ;;  %v482_v42 = vpop.f32.mrb[11].mxu0 }
 0x12e   : > { %v485_v43 = vpack.c.bf16 %v480_v39, %v480_v39 }
 0x12f   : > { %v580_v44 = vsel %vm282_vm0, %v484_v41, 0  ;;  %v487_v45 = vld [vmem:[#allocation3] sm:$0x77] }
 0x130   : > { %1277 = vmatprep.subr.msk.bf16.mxu1 %vm282_vm0, %v485_v43  ;;  %v1295_v46 = vcombine.high %v487_v45, %v487_v45 }
 0x131   : > { %586 = vmatpush1.bf16.msra.mxu1 %v580_v44 }
 0x132   : > { %1121 = vmatprep.mubr.bf16.mxu0 %v1295_v46 }
 0x145   : > { %515 = vxpose.xlu1.c.b16.start.end [1/1] (short) %v496_v47, 128 }
 0x18e   : > { %v507_v48 = vpop.trf.xlu1 }
 0x18f   : > { %1278 = vmatmul.mubr.msk.bf16.vlgmr.msra.gmra.mrb[0].mxu1 %vm278_vm1, %v507_v48 }
 0x190   : > { %627 = vmatprep.mubr.bf16.mxu1 %v1629_v0 }
 0x192   : > { %v508_v49 = vpop.trf.xlu1 }
 0x196   : > { %v509_v50 = vpop.trf.xlu1 }
 0x197   : > { %1279 = vmatmul.mubr.msk.bf16.gmra.mrb[4].mxu1 %vm278_vm1, %v508_v49 }
 0x198   : > { %637 = vmatprep.mubr.bf16.mxu1 %v1629_v0 }
 0x19a   : > { %v510_v51 = vpop.trf.xlu1 }
 0x19e   : > { %v511_v52 = vpop.trf.xlu1 }
 0x19f   : > { %1280 = vmatmul.mubr.msk.bf16.gmra.mrb[8].mxu1 %vm278_vm1, %v509_v50 }
 0x1a0   : > { %647 = vmatprep.mubr.bf16.mxu1 %v1629_v0 }
 0x1a2   : > { %v512_v53 = vpop.trf.xlu1 }
 0x1a6   : > { %v513_v54 = vpop.trf.xlu1 }
 0x1a7   : > { %1281 = vmatmul.mubr.msk.bf16.gmra.mrb[12].mxu1 %vm278_vm1, %v510_v51 }
 0x1a8   : > { %657 = vmatprep.mubr.bf16.mxu1 %v1629_v0 }
 0x1aa   : > { %v514_v55 = vpop.trf.xlu1 }
 0x1ae   : > { %v523_v56 = vpop.trf.xlu1 }
 0x1af   : > { %1282 = vmatmul.mubr.msk.bf16.gmra.mrb[16].mxu1 %vm278_vm1, %v511_v52 }
 0x1b0   : > { %667 = vmatprep.mubr.bf16.mxu1 %v1629_v0 }
 0x1b2   : > { %v524_v57 = vpop.trf.xlu1 }
 0x1b6   : > { %v525_v58 = vpop.trf.xlu1 }
 0x1b7   : > { %1283 = vmatmul.mubr.msk.bf16.gmra.mrb[20].mxu1 %vm278_vm1, %v512_v53 }
 0x1b8   : > { %677 = vmatprep.mubr.bf16.mxu1 %v1629_v0 }
 0x1ba   : > { %v526_v59 = vpop.trf.xlu1 }
 0x1be   : > { %v527_v60 = vpop.trf.xlu1 }
 0x1bf   : > { %1284 = vmatmul.mubr.msk.bf16.gmra.mrb[24].mxu1 %vm278_vm1, %v513_v54 }
 0x1c0   : > { %687 = vmatprep.mubr.bf16.mxu1 %v1629_v0 }
 0x1c2   : > { %v528_v61 = vpop.trf.xlu1 }
 0x1c6   : > { %v529_v62 = vpop.trf.xlu1 }
 0x1c7   : > { %1285 = vmatmul.mubr.msk.bf16.gmra.mrb[28].mxu1 %vm278_vm1, %v514_v55 }
 0x1c8   : > { %697 = vmatprep.mubr.bf16.mxu1 %v1629_v0 }
 0x1ca   : > { %v530_v63 = vpop.trf.xlu1 }
 0x1cf   : > { %1286 = vmatmul.mubr.msk.bf16.gmra.mrb[32].mxu1 %vm278_vm1, %v523_v56 }
 0x1d0   : > { %707 = vmatprep.mubr.bf16.mxu1 %v1629_v0 }
 0x1d7   : > { %1287 = vmatmul.mubr.msk.bf16.gmra.mrb[36].mxu1 %vm278_vm1, %v524_v57 }
 0x1d8   : > { %717 = vmatprep.mubr.bf16.mxu1 %v1629_v0 }
 0x1df   : > { %1288 = vmatmul.mubr.msk.bf16.gmra.mrb[40].mxu1 %vm278_vm1, %v525_v58 }
 0x1e0   : > { %727 = vmatprep.mubr.bf16.mxu1 %v1629_v0 }
 0x1e7   : > { %1289 = vmatmul.mubr.msk.bf16.gmra.mrb[44].mxu1 %vm278_vm1, %v526_v59 }
 0x1e8   : > { %737 = vmatprep.mubr.bf16.mxu1 %v1629_v0 }
 0x1ef   : > { %1290 = vmatmul.mubr.msk.bf16.gmra.mrb[48].mxu1 %vm278_vm1, %v527_v60 }
 0x1f0   : > { %747 = vmatprep.mubr.bf16.mxu1 %v1629_v0 }
 0x1f7   : > { %1291 = vmatmul.mubr.msk.bf16.gmra.mrb[52].mxu1 %vm278_vm1, %v528_v61 }
 0x1f8   : > { %757 = vmatprep.mubr.bf16.mxu1 %v1629_v0 }
 0x1ff   : > { %1292 = vmatmul.mubr.msk.bf16.gmra.mrb[56].mxu1 %vm278_vm1, %v529_v62 }
 0x200   : > { %767 = vmatprep.mubr.bf16.mxu1 %v1629_v0 }
 0x207   : > { %1293 = vmatmul.mubr.msk.bf16.gmra.mrb[60].mxu1 %vm278_vm1, %v530_v63 }
 0x262   : > { %v1860_v1 = vpop.f32.mrb[0].mxu1 }
 0x263   : > { %v1862_v2 = vpop.f32.mrb[1].mxu1 }
 0x264   : > { %v1864_v3 = vpop.f32.mrb[2].mxu1 }
 0x265   : > { %v1866_v5 = vpop.f32.mrb[3].mxu1 }
 0x26a   : > { %v1868_v6 = vpop.f32.mrb[4].mxu1 }
 0x26b   : > { %v778_v7 = vmax.f32 %v1860_v1, %v1868_v6  ;;  %v1872_v8 = vpop.f32.mrb[5].mxu1 }
 0x26c   : > { %v815_v0 = vmax.f32 %v1862_v2, %v1872_v8  ;;  %v1876_v9 = vpop.f32.mrb[6].mxu1 }
 0x26d   : > { %v779_v10 = vmax.f32 %v1864_v3, %v1876_v9  ;;  %v1880_v11 = vpop.f32.mrb[7].mxu1 }
 0x26e   : > { %v816_v12 = vmax.f32 %v1866_v5, %v1880_v11 }
 0x272   : > { %v1884_v13 = vpop.f32.mrb[8].mxu1 }
 0x273   : > { %v780_v14 = vmax.f32 %v778_v7, %v1884_v13  ;;  %v1887_v15 = vpop.f32.mrb[9].mxu1 }
 0x274   : > { %v817_v16 = vmax.f32 %v815_v0, %v1887_v15  ;;  %v1890_v17 = vpop.f32.mrb[10].mxu1 }
 0x275   : > { %v781_v18 = vmax.f32 %v779_v10, %v1890_v17  ;;  %v1893_v19 = vpop.f32.mrb[11].mxu1 }
 0x276   : > { %v818_v20 = vmax.f32 %v816_v12, %v1893_v19 }
 0x27a   : > { %v1896_v21 = vpop.f32.mrb[12].mxu1 }
 0x27b   : > { %v782_v22 = vmax.f32 %v780_v14, %v1896_v21  ;;  %v1899_v23 = vpop.f32.mrb[13].mxu1 }
 0x27c   : > { %v819_v24 = vmax.f32 %v817_v16, %v1899_v23  ;;  %v1902_v25 = vpop.f32.mrb[14].mxu1 }
 0x27d   : > { %v783_v26 = vmax.f32 %v781_v18, %v1902_v25  ;;  %v1905_v27 = vpop.f32.mrb[15].mxu1 }
 0x27e   : > { %v820_v28 = vmax.f32 %v818_v20, %v1905_v27 }
 0x282   : > { %v1908_v29 = vpop.f32.mrb[16].mxu1 }
 0x283   : > { %v784_v30 = vmax.f32 %v782_v22, %v1908_v29  ;;  %v1911_v31 = vpop.f32.mrb[17].mxu1 }
 0x284   : > { %v821_v32 = vmax.f32 %v819_v24, %v1911_v31  ;;  %v1914_v33 = vpop.f32.mrb[18].mxu1 }
 0x285   : > { %v785_v34 = vmax.f32 %v783_v26, %v1914_v33  ;;  %v1917_v35 = vpop.f32.mrb[19].mxu1 }
 0x286   : > { %v822_v36 = vmax.f32 %v820_v28, %v1917_v35 }
 0x28a   : > { %v1920_v37 = vpop.f32.mrb[20].mxu1 }
 0x28b   : > { %v786_v38 = vmax.f32 %v784_v30, %v1920_v37  ;;  %v1923_v39 = vpop.f32.mrb[21].mxu1 }
 0x28c   : > { %2501 = vst [vmem:[#allocation13_spill] sm:$0xff] %v1923_v39  ;;  %v823_v40 = vmax.f32 %v821_v32, %v1923_v39  ;;  %v1926_v41 = vpop.f32.mrb[22].mxu1 }
 0x28d   : > { %v787_v42 = vmax.f32 %v785_v34, %v1926_v41  ;;  %v1929_v43 = vpop.f32.mrb[23].mxu1 }
 0x28e   : > { %2502 = vst [vmem:[#allocation14_spill] sm:$0xff] %v1929_v43  ;;  %v824_v44 = vmax.f32 %v822_v36, %v1929_v43 }
 0x292   : > { %v1932_v45 = vpop.f32.mrb[24].mxu1 }
 0x293   : > { %v788_v46 = vmax.f32 %v786_v38, %v1932_v45  ;;  %v1935_v47 = vpop.f32.mrb[25].mxu1 }
 0x294   : > { %2503 = vst [vmem:[#allocation15_spill] sm:$0xff] %v1935_v47  ;;  %v825_v48 = vmax.f32 %v823_v40, %v1935_v47  ;;  %v1938_v49 = vpop.f32.mrb[26].mxu1 }
 0x295   : > { %v789_v50 = vmax.f32 %v787_v42, %v1938_v49  ;;  %v1941_v51 = vpop.f32.mrb[27].mxu1 }
 0x296   : > { %2504 = vst [vmem:[#allocation16_spill] sm:$0xff] %v1941_v51  ;;  %v826_v52 = vmax.f32 %v824_v44, %v1941_v51 }
 0x29a   : > { %v1944_v53 = vpop.f32.mrb[28].mxu1 }
 0x29b   : > { %v790_v54 = vmax.f32 %v788_v46, %v1944_v53  ;;  %v1947_v55 = vpop.f32.mrb[29].mxu1 }
 0x29c   : > { %2505 = vst [vmem:[#allocation17_spill] sm:$0xff] %v1947_v55  ;;  %v827_v56 = vmax.f32 %v825_v48, %v1947_v55  ;;  %v1950_v57 = vpop.f32.mrb[30].mxu1 }
 0x29d   : > { %v791_v58 = vmax.f32 %v789_v50, %v1950_v57  ;;  %v1953_v59 = vpop.f32.mrb[31].mxu1 }
 0x29e   : > { %2506 = vst [vmem:[#allocation18_spill] sm:$0xff] %v1953_v59  ;;  %v828_v60 = vmax.f32 %v826_v52, %v1953_v59 }
 0x2a2   : > { %v1956_v61 = vpop.f32.mrb[32].mxu1 }
 0x2a3   : > { %v792_v62 = vmax.f32 %v790_v54, %v1956_v61  ;;  %v1959_v63 = vpop.f32.mrb[33].mxu1 }
 0x2a4   : > { %2507 = vst [vmem:[#allocation19_spill] sm:$0xff] %v1959_v63  ;;  %v829_v7 = vmax.f32 %v827_v56, %v1959_v63  ;;  %v1962_v0 = vpop.f32.mrb[34].mxu1 }
 0x2a5   : > { %v793_v10 = vmax.f32 %v791_v58, %v1962_v0  ;;  %v1965_v12 = vpop.f32.mrb[35].mxu1 }
 0x2a6   : > { %2508 = vst [vmem:[#allocation20_spill] sm:$0xff] %v1965_v12  ;;  %v830_v14 = vmax.f32 %v828_v60, %v1965_v12 }
 0x2aa   : > { %v1968_v16 = vpop.f32.mrb[36].mxu1 }
 0x2ab   : > { %v794_v18 = vmax.f32 %v792_v62, %v1968_v16  ;;  %v1971_v20 = vpop.f32.mrb[37].mxu1 }
 0x2ac   : > { %2509 = vst [vmem:[#allocation21_spill] sm:$0xff] %v1971_v20  ;;  %v831_v22 = vmax.f32 %v829_v7, %v1971_v20  ;;  %v1974_v24 = vpop.f32.mrb[38].mxu1 }
 0x2ad   : > { %v795_v26 = vmax.f32 %v793_v10, %v1974_v24  ;;  %v1977_v28 = vpop.f32.mrb[39].mxu1 }
 0x2ae   : > { %2510 = vst [vmem:[#allocation22_spill] sm:$0xff] %v1977_v28  ;;  %v832_v30 = vmax.f32 %v830_v14, %v1977_v28 }
 0x2b2   : > { %v1980_v32 = vpop.f32.mrb[40].mxu1 }
 0x2b3   : > { %v796_v34 = vmax.f32 %v794_v18, %v1980_v32  ;;  %v1983_v36 = vpop.f32.mrb[41].mxu1 }
 0x2b4   : > { %2511 = vst [vmem:[#allocation23_spill] sm:$0xff] %v1983_v36  ;;  %v833_v38 = vmax.f32 %v831_v22, %v1983_v36  ;;  %v1986_v40 = vpop.f32.mrb[42].mxu1 }
 0x2b5   : > { %v797_v42 = vmax.f32 %v795_v26, %v1986_v40  ;;  %v1989_v44 = vpop.f32.mrb[43].mxu1 }
 0x2b6   : > { %2512 = vst [vmem:[#allocation24_spill] sm:$0xff] %v1989_v44  ;;  %v834_v46 = vmax.f32 %v832_v30, %v1989_v44 }
 0x2ba   : > { %v1992_v48 = vpop.f32.mrb[44].mxu1 }
 0x2bb   : > { %v798_v50 = vmax.f32 %v796_v34, %v1992_v48  ;;  %v1995_v52 = vpop.f32.mrb[45].mxu1 }
 0x2bc   : > { %2513 = vst [vmem:[#allocation25_spill] sm:$0xff] %v1995_v52  ;;  %v835_v54 = vmax.f32 %v833_v38, %v1995_v52  ;;  %v1998_v56 = vpop.f32.mrb[46].mxu1 }
 0x2bd   : > { %2514 = vst [vmem:[#allocation26_spill] sm:$0xff] %v1998_v56  ;;  %v799_v58 = vmax.f32 %v797_v42, %v1998_v56  ;;  %v2001_v60 = vpop.f32.mrb[47].mxu1 }
 0x2be   : > { %2515 = vst [vmem:[#allocation27_spill] sm:$0xff] %v2001_v60  ;;  %v836_v62 = vmax.f32 %v834_v46, %v2001_v60 }
 0x2c2   : > { %v2004_v7 = vpop.f32.mrb[48].mxu1 }
 0x2c3   : > { %2516 = vst [vmem:[#allocation28_spill] sm:$0xff] %v2004_v7  ;;  %v800_v10 = vmax.f32 %v798_v50, %v2004_v7  ;;  %v2007_v14 = vpop.f32.mrb[49].mxu1 }
 0x2c4   : > { %2517 = vst [vmem:[#allocation29_spill] sm:$0xff] %v2007_v14  ;;  %v837_v18 = vmax.f32 %v835_v54, %v2007_v14  ;;  %v2010_v22 = vpop.f32.mrb[50].mxu1 }
 0x2c5   : > { %2518 = vst [vmem:[#allocation30_spill] sm:$0xff] %v2010_v22  ;;  %v801_v26 = vmax.f32 %v799_v58, %v2010_v22  ;;  %v2013_v30 = vpop.f32.mrb[51].mxu1 }
 0x2c6   : > { %2519 = vst [vmem:[#allocation31_spill] sm:$0xff] %v2013_v30  ;;  %v838_v34 = vmax.f32 %v836_v62, %v2013_v30 }
 0x2ca   : > { %v2016_v38 = vpop.f32.mrb[52].mxu1 }
 0x2cb   : > { %2520 = vst [vmem:[#allocation32_spill] sm:$0xff] %v2016_v38  ;;  %v802_v42 = vmax.f32 %v800_v10, %v2016_v38  ;;  %v2019_v46 = vpop.f32.mrb[53].mxu1 }
 0x2cc   : > { %2521 = vst [vmem:[#allocation33_spill] sm:$0xff] %v2019_v46  ;;  %v839_v50 = vmax.f32 %v837_v18, %v2019_v46  ;;  %v2022_v4 = vpop.f32.mrb[54].mxu1 }
 0x2cd   : > { %2522 = vst [vmem:[#allocation34_spill] sm:$0xff] %v2022_v4  ;;  %v803_v54 = vmax.f32 %v801_v26, %v2022_v4  ;;  %v2025_v14 = vpop.f32.mrb[55].mxu1 }
 0x2ce   : > { %2523 = vst [vmem:[#allocation35_spill] sm:$0xff] %v2025_v14  ;;  %v840_v58 = vmax.f32 %v838_v34, %v2025_v14 }
 0x2d2   : > { %v2028_v60 = vpop.f32.mrb[56].mxu1 }
 0x2d3   : > { %2524 = vst [vmem:[#allocation36_spill] sm:$0xff] %v2028_v60  ;;  %v804_v62 = vmax.f32 %v802_v42, %v2028_v60  ;;  %v2031_v30 = vpop.f32.mrb[57].mxu1 }
 0x2d4   : > { %2525 = vst [vmem:[#allocation37_spill] sm:$0xff] %v2031_v30  ;;  %v841_v10 = vmax.f32 %v839_v50, %v2031_v30  ;;  %v2034_v52 = vpop.f32.mrb[58].mxu1 }
 0x2d5   : > { %2526 = vst [vmem:[#allocation38_spill] sm:$0xff] %v2034_v52  ;;  %v805_v18 = vmax.f32 %v803_v54, %v2034_v52  ;;  %v2037_v46 = vpop.f32.mrb[59].mxu1 }
 0x2d6   : > { %2527 = vst [vmem:[#allocation39_spill] sm:$0xff] %v2037_v46  ;;  %v842_v26 = vmax.f32 %v840_v58, %v2037_v46 }
 0x2da   : > { %v2040_v44 = vpop.f32.mrb[60].mxu1 }
 0x2db   : > { %2528 = vst [vmem:[#allocation40_spill] sm:$0xff] %v2040_v44  ;;  %v806_v34 = vmax.f32 %v804_v62, %v2040_v44  ;;  %v2043_v14 = vpop.f32.mrb[61].mxu1  ;;  %v2547_v44 = vld [vmem:[#allocation37_spill] sm:$0xff] }
 0x2dc   : > { %v843_v42 = vmax.f32 %v841_v10, %v2043_v14  ;;  %v773_v36 = vpop.f32.mrb[62].mxu1 }
 0x2dd   : > { %v807_v28 = vmax.f32 %v805_v18, %v773_v36  ;;  %v775_v20 = vpop.f32.mrb[63].mxu1  ;;  %v2548_v52 = vld [vmem:[#allocation39_spill] sm:$0xff] }
 0x2de   : > { %v844_v50 = vmax.f32 %v842_v26, %v775_v20 }
 0x2df   : > { %v808_v30 = vmax.f32 %v806_v34, %v807_v28 }
 0x2e0   : > { %v845_v12 = vmax.f32 %v843_v42, %v844_v50 }
 0x2e1   : > { %v809_v63 = vrot.slane %v808_v30, 4 }
 0x2e2   : > { %v846_v54 = vrot.slane %v845_v12, 4 }
 0x2e3   : > { %v810_v59 = vmax.f32 %v808_v30, %v809_v63  ;;  %v2543_v63 = vld [vmem:[#allocation29_spill] sm:$0xff] }
 0x2e4   : > { %v847_v55 = vmax.f32 %v845_v12, %v846_v54  ;;  %v2542_v12 = vld [vmem:[#allocation27_spill] sm:$0xff] }
 0x2e5   : > { %v811_v51 = vrot.slane %v810_v59, 2 }
 0x2e6   : > { %v848_v58 = vrot.slane %v847_v55, 2 }
 0x2e7   : > { %v812_v46 = vmax.f32 %v810_v59, %v811_v51  ;;  %v2538_v59 = vld [vmem:[#allocation22_spill] sm:$0xff] }
 0x2e8   : > { %v849_v47 = vmax.f32 %v847_v55, %v848_v58  ;;  %v2539_v55 = vld [vmem:[#allocation23_spill] sm:$0xff] }
 0x2e9   : > { %v813_v43 = vrot.slane %v812_v46, 1 }
 0x2ea   : > { %v850_v39 = vrot.slane %v849_v47, 1 }
 0x2eb   : > { %v2046_v62 = vmax.f32 %v812_v46, %v813_v43  ;;  %v2536_v46 = vld [vmem:[#allocation20_spill] sm:$0xff] }
 0x2ec   : > { %v2083_v30 = vmax.f32 %v849_v47, %v850_v39  ;;  %v2540_v43 = vld [vmem:[#allocation24_spill] sm:$0xff] }
 0x2ed   : > { %v920_v10 = vsub.f32 %v773_v36, %v2046_v62  ;;  %v2549_v4 = vsub.f32 %v1860_v1, %v2046_v62  ;;  %v2550_v22 = vsub.f32 %v1864_v3, %v2046_v62  ;;  %v2551_v7 = vsub.f32 %v1868_v6, %v2046_v62 }
 0x2ee   : > { %v921_v47 = vsub.f32 %v775_v20, %v2083_v30  ;;  %v859_v34 = vsub.f32 %v1862_v2, %v2083_v30  ;;  %v861_v42 = vsub.f32 %v1866_v5, %v2083_v30  ;;  %v863_v50 = vsub.f32 %v1872_v8, %v2083_v30  ;;  %v2533_v2 = vld [vmem:[#allocation17_spill] sm:$0xff]  ;;  %v2534_v5 = vld [vmem:[#allocation18_spill] sm:$0xff]  ;;  %v2535_v8 = vld [vmem:[#allocation19_spill] sm:$0xff] }
 0x2ef   : > { %v865_v54 = vsub.f32 %v1880_v11, %v2083_v30  ;;  %v867_v58 = vsub.f32 %v1887_v15, %v2083_v30  ;;  %v1046_v26 = vmul.f32 1.442695, %v920_v10  ;;  %v869_v39 = vsub.f32 %v1893_v19, %v2083_v30  ;;  %v2529_v11 = vld [vmem:[#allocation13_spill] sm:$0xff]  ;;  %v2530_v15 = vld [vmem:[#allocation14_spill] sm:$0xff]  ;;  %v2531_v19 = vld [vmem:[#allocation15_spill] sm:$0xff] }
 0x2f0   : > { %v871_v20 = vsub.f32 %v1899_v23, %v2083_v30  ;;  %v1048_v36 = vmul.f32 1.442695, %v921_v47  ;;  %v2532_v23 = vld [vmem:[#allocation16_spill] sm:$0xff]  ;;  %v2537_v47 = vld [vmem:[#allocation21_spill] sm:$0xff]  ;;  %v2544_v10 = vld [vmem:[#allocation31_spill] sm:$0xff]  ;;  %v2552_v51 = vsub.f32 %v1876_v9, %v2046_v62  ;;  %v2555_v3 = vsub.f32 %v1896_v21, %v2046_v62 }
 0x2f1   : > { %1376 = vpow2.f32 %v1046_v26  ;;  %v922_v38 = vmul.f32 1.442695, %v2549_v4  ;;  %v926_v28 = vmul.f32 1.442695, %v2550_v22  ;;  %v930_v18 = vmul.f32 1.442695, %v2551_v7 }
 0x2f2   : > { %1378 = vpow2.f32 %v1048_v36  ;;  %v934_v56 = vmul.f32 1.442695, %v2552_v51  ;;  %v2553_v26 = vsub.f32 %v1884_v13, %v2046_v62  ;;  %v2554_v4 = vsub.f32 %v1890_v17, %v2046_v62 }
 0x2f3   : > { %1380 = vpow2.f32 %v922_v38  ;;  %v946_v6 = vmul.f32 1.442695, %v2555_v3  ;;  %v2556_v7 = vsub.f32 %v1902_v25, %v2046_v62  ;;  %v2557_v13 = vsub.f32 %v1908_v29, %v2046_v62 }
 0x2f4   : > { %v938_v60 = vmul.f32 1.442695, %v2553_v26  ;;  %v942_v1 = vmul.f32 1.442695, %v2554_v4  ;;  %1382 = vpow2.f32 %v926_v28  ;;  %v2558_v17 = vsub.f32 %v1914_v33, %v2046_v62 }
 0x2f5   : > { %1384 = vpow2.f32 %v930_v18  ;;  %v950_v9 = vmul.f32 1.442695, %v2556_v7  ;;  %v954_v22 = vmul.f32 1.442695, %v2557_v13  ;;  %v924_v18 = vmul.f32 1.442695, %v859_v34 }
 0x2f6   : > { %1386 = vpow2.f32 %v934_v56  ;;  %v958_v38 = vmul.f32 1.442695, %v2558_v17  ;;  %v928_v28 = vmul.f32 1.442695, %v861_v42  ;;  %v932_v56 = vmul.f32 1.442695, %v863_v50 }
 0x2f7   : > { %1388 = vpow2.f32 %v938_v60  ;;  %v936_v51 = vmul.f32 1.442695, %v865_v54  ;;  %v940_v60 = vmul.f32 1.442695, %v867_v58  ;;  %v944_v33 = vmul.f32 1.442695, %v869_v39 }
 0x2f8   : > { %1390 = vpow2.f32 %v942_v1  ;;  %v948_v4 = vmul.f32 1.442695, %v871_v20  ;;  %v2559_v34 = vsub.f32 %v1905_v27, %v2083_v30  ;;  %v2560_v54 = vsub.f32 %v1911_v31, %v2083_v30 }
 0x2f9   : > { %1392 = vpow2.f32 %v946_v6  ;;  %v2561_v39 = vsub.f32 %v1917_v35, %v2083_v30  ;;  %v2562_v27 = vsub.f32 %v1920_v37, %v2046_v62  ;;  %v2563_v31 = vsub.f32 %v2529_v11, %v2083_v30 }
 0x2fa   : > { %1394 = vpow2.f32 %v950_v9  ;;  %v952_v42 = vmul.f32 1.442695, %v2559_v34  ;;  %v956_v58 = vmul.f32 1.442695, %v2560_v54  ;;  %v2564_v35 = vsub.f32 %v1926_v41, %v2046_v62 }
 0x2fb   : > { %v2206_v21 = vpop.eup %1376  ;;  %1396 = vpow2.f32 %v954_v22  ;;  %v960_v20 = vmul.f32 1.442695, %v2561_v39  ;;  %v962_v7 = vmul.f32 1.442695, %v2562_v27  ;;  %v964_v13 = vmul.f32 1.442695, %v2563_v31 }
 0x2fc   : > { %v2208_v25 = vpop.eup %1378  ;;  %1398 = vpow2.f32 %v958_v38  ;;  %v966_v17 = vmul.f32 1.442695, %v2564_v35  ;;  %v2565_v38 = vsub.f32 %v2530_v15, %v2083_v30  ;;  %v2573_v35 = vsub.f32 %v2534_v5, %v2083_v30 }
 0x2fd   : > { %v1381_v29 = vpop.eup %1380  ;;  %1400 = vpow2.f32 %v924_v18 }
 0x2fe   : > { %v1383_v36 = vpop.eup %1382  ;;  %1402 = vpow2.f32 %v928_v28  ;;  %v968_v37 = vmul.f32 1.442695, %v2565_v38 }
 0x2ff   : > { %v2210_v26 = vpop.eup %1384  ;;  %1404 = vpow2.f32 %v932_v56  ;;  %v1050_v18 = vpack.c.bf16 %v1383_v36, %v1381_v29  ;;  %v2567_v36 = vsub.f32 %v2531_v19, %v2083_v30 }
 0x300   : > { %v2212_v1 = vpop.eup %1386  ;;  %1406 = vpow2.f32 %v936_v51 }
 0x301   : > { %v2217_v50 = vpop.eup %1388  ;;  %1408 = vpow2.f32 %v940_v60  ;;  %v1052_v56 = vpack.c.bf16 %v2212_v1, %v2210_v26  ;;  %v2566_v60 = vsub.f32 %v1932_v45, %v2046_v62  ;;  %v972_v26 = vmul.f32 1.442695, %v2567_v36 }
 0x302   : > { %v2222_v3 = vpop.eup %1390  ;;  %1410 = vpow2.f32 %v944_v33  ;;  %v2568_v1 = vsub.f32 %v1938_v49, %v2046_v62  ;;  %v2569_v45 = vsub.f32 %v2532_v23, %v2083_v30  ;;  %v2571_v49 = vsub.f32 %v2533_v2, %v2083_v30 }
 0x303   : > { %v2227_v6 = vpop.eup %1392  ;;  %1412 = vpow2.f32 %v948_v4  ;;  %v1054_v11 = vpack.c.bf16 %v2222_v3, %v2217_v50  ;;  %v970_v33 = vmul.f32 1.442695, %v2566_v60  ;;  %v2570_v3 = vsub.f32 %v1944_v53, %v2046_v62 }
 0x304   : > { %v2232_v9 = vpop.eup %1394  ;;  %1414 = vpow2.f32 %v952_v42  ;;  %v974_v34 = vmul.f32 1.442695, %v2568_v1  ;;  %v976_v54 = vmul.f32 1.442695, %v2569_v45  ;;  %v980_v27 = vmul.f32 1.442695, %v2571_v49 }
 0x305   : > { %v2237_v22 = vpop.eup %1396  ;;  %1416 = vpow2.f32 %v956_v58  ;;  %v1056_v51 = vpack.c.bf16 %v2232_v9, %v2227_v6  ;;  %v978_v39 = vmul.f32 1.442695, %v2570_v3  ;;  %v2572_v23 = vsub.f32 %v1950_v57, %v2046_v62 }
 0x306   : > { %v2245_v28 = vpop.eup %1398  ;;  %1418 = vpow2.f32 %v960_v20  ;;  %v2574_v2 = vsub.f32 %v1956_v61, %v2046_v62  ;;  %v2575_v57 = vsub.f32 %v2535_v8, %v2083_v30  ;;  %v2577_v61 = vsub.f32 %v2536_v46, %v2083_v30 }
 0x307   : > { %v1401_v41 = vpop.eup %1400  ;;  %1420 = vpow2.f32 %v962_v7  ;;  %v1058_v15 = vpack.c.bf16 %v2245_v28, %v2237_v22  ;;  %v982_v31 = vmul.f32 1.442695, %v2572_v23  ;;  %v2578_v8 = vsub.f32 %v1968_v16, %v2046_v62 }
 0x308   : > { %v1403_v29 = vpop.eup %1402  ;;  %1422 = vpow2.f32 %v964_v13  ;;  %v988_v60 = vmul.f32 1.442695, %v2575_v57  ;;  %v2581_v16 = vsub.f32 %v2538_v59, %v2083_v30  ;;  %v2584_v59 = vsub.f32 %v1986_v40, %v2046_v62 }
 0x309   : > { %v1405_v4 = vpop.eup %1404  ;;  %1424 = vpow2.f32 %v966_v17  ;;  %v1051_v42 = vpack.c.bf16 %v1403_v29, %v1401_v41  ;;  %v984_v17 = vmul.f32 1.442695, %v2573_v35  ;;  %v2576_v29 = vsub.f32 %v1962_v0, %v2046_v62  ;;  %v2587_v35 = vld [vmem:[#allocation25_spill] sm:$0xff] }
 0x30a   : > { %v1407_v50 = vpop.eup %1406  ;;  %1426 = vpow2.f32 %v968_v37  ;;  %v986_v37 = vmul.f32 1.442695, %v2574_v2  ;;  %v2579_v0 = vsub.f32 %v2537_v47, %v2083_v30  ;;  %v2582_v47 = vsub.f32 %v1980_v32, %v2046_v62 }
 0x30b   : > { %v1409_v58 = vpop.eup %1408  ;;  %1428 = vpow2.f32 %v970_v33  ;;  %1089 = vmatprep.subr.bf16.mxu0 %v1051_v42  ;;  %v1053_v19 = vpack.c.bf16 %v1407_v50, %v1405_v4  ;;  %v990_v5 = vmul.f32 1.442695, %v2576_v29  ;;  %v992_v4 = vmul.f32 1.442695, %v2577_v61  ;;  %v2592_v29 = vld [vmem:[#allocation28_spill] sm:$0xff] }
 0x30c   : > { %v1411_v20 = vpop.eup %1410  ;;  %1430 = vpow2.f32 %v972_v26  ;;  %1090 = vmatpush1.bf16.msra.mxu0 %v1050_v18  ;;  %v996_v42 = vmul.f32 1.442695, %v2579_v0  ;;  %v1006_v23 = vmul.f32 1.442695, %v2584_v59  ;;  %v2586_v6 = vsub.f32 %v1992_v48, %v2046_v62 }
 0x30d   : > { %v1413_v7 = vpop.eup %1412  ;;  %1432 = vpow2.f32 %v974_v34  ;;  %1091 = vmatprep.subr.bf16.mxu0 %v1053_v19  ;;  %v1055_v13 = vpack.c.bf16 %v1411_v20, %v1409_v58  ;;  %v994_v34 = vmul.f32 1.442695, %v2578_v8  ;;  %v2588_v40 = vsub.f32 %v2587_v35, %v2083_v30 }
 0x30e   : > { %v1415_v53 = vpop.eup %1414  ;;  %1434 = vpow2.f32 %v976_v54  ;;  %v2580_v54 = vsub.f32 %v1974_v24, %v2046_v62  ;;  %v2583_v24 = vsub.f32 %v2539_v55, %v2083_v30  ;;  %v1010_v9 = vmul.f32 1.442695, %v2586_v6 }
 0x30f   : > { %v1417_v38 = vpop.eup %1416  ;;  %1436 = vpow2.f32 %v978_v39  ;;  %v1057_v18 = vpack.c.bf16 %v1415_v53, %v1413_v7  ;;  %v1000_v39 = vmul.f32 1.442695, %v2581_v16  ;;  %v2591_v57 = vsub.f32 %v2542_v12, %v2083_v30 }
 0x310   : > { %v1419_v41 = vpop.eup %1418  ;;  %1438 = vpow2.f32 %v980_v27  ;;  %1092 = vmatpush1.bf16.msra.mxu0 %v1052_v56  ;;  %v998_v46 = vmul.f32 1.442695, %v2580_v54  ;;  %v1004_v49 = vmul.f32 1.442695, %v2583_v24  ;;  %v2593_v22 = vsub.f32 %v2592_v29, %v2046_v62  ;;  %v2604_v24 = vld [vmem:[#allocation35_spill] sm:$0xff] }
 0x311   : > { %v1421_v33 = vpop.eup %1420  ;;  %1440 = vpow2.f32 %v982_v31  ;;  %1093 = vmatprep.subr.bf16.mxu0 %v1055_v13  ;;  %v1059_v36 = vpack.c.bf16 %v1419_v41, %v1417_v38  ;;  %v2585_v13 = vsub.f32 %v2540_v43, %v2083_v30  ;;  %v2589_v43 = vld [vmem:[#allocation26_spill] sm:$0xff] }
 0x312   : > { %v1423_v26 = vpop.eup %1422  ;;  %1442 = vpow2.f32 %v984_v17  ;;  %v1012_v17 = vmul.f32 1.442695, %v2588_v40  ;;  %v1018_v28 = vmul.f32 1.442695, %v2593_v22 }
 0x313   : > { %v1425_v1 = vpop.eup %1424  ;;  %1444 = vpow2.f32 %v986_v37  ;;  %v1008_v55 = vmul.f32 1.442695, %v2585_v13  ;;  %v2590_v37 = vsub.f32 %v2589_v43, %v2046_v62  ;;  %v2608_v13 = vsub.f32 %v2547_v44, %v2083_v30 }
 0x314   : > { %v1427_v56 = vpop.eup %1426  ;;  %1446 = vpow2.f32 %v988_v60  ;;  %1094 = vmatpush1.bf16.msra.mxu0 %v1054_v11  ;;  %v1060_v50 = vpack.c.bf16 %v1425_v1, %v1421_v33  ;;  %v1002_v11 = vmul.f32 1.442695, %v2582_v47  ;;  %v1016_v60 = vmul.f32 1.442695, %v2591_v57 }
 0x315   : > { %v1429_v45 = vpop.eup %1428  ;;  %1448 = vpow2.f32 %v990_v5  ;;  %1095 = vmatprep.subr.bf16.mxu0 %v1057_v18  ;;  %v1061_v58 = vpack.c.bf16 %v1427_v56, %v1423_v26  ;;  %v1014_v18 = vmul.f32 1.442695, %v2590_v37  ;;  %v2594_v5 = vsub.f32 %v2543_v63, %v2083_v30 }
 0x316   : > { %v1431_v3 = vpop.eup %1430  ;;  %1450 = vpow2.f32 %v992_v4  ;;  %v2595_v4 = vld [vmem:[#allocation30_spill] sm:$0xff]  ;;  %v2597_v56 = vsub.f32 %v2544_v10, %v2083_v30 }
 0x317   : > { %v1433_v19 = vpop.eup %1432  ;;  %1452 = vpow2.f32 %v994_v34  ;;  %v2596_v1 = vsub.f32 %v2595_v4, %v2046_v62 }
 0x318   : > { %v1435_v20 = vpop.eup %1434  ;;  %1454 = vpow2.f32 %v996_v42  ;;  %1096 = vmatpush1.bf16.msra.mxu0 %v1056_v51  ;;  %v1062_v27 = vpack.c.bf16 %v1433_v19, %v1429_v45  ;;  %v1024_v0 = vmul.f32 1.442695, %v2597_v56  ;;  %v2598_v45 = vld [vmem:[#allocation32_spill] sm:$0xff]  ;;  %v2602_v19 = vld [vmem:[#allocation34_spill] sm:$0xff] }
 0x319   : > { %v1437_v7 = vpop.eup %1436  ;;  %1456 = vpow2.f32 %v998_v46  ;;  %1097 = vmatprep.subr.bf16.mxu0 %v1059_v36  ;;  %v1063_v32 = vpack.c.bf16 %v1435_v20, %v1431_v3  ;;  %v1020_v36 = vmul.f32 1.442695, %v2594_v5  ;;  %v1022_v12 = vmul.f32 1.442695, %v2596_v1  ;;  %v2600_v46 = vld [vmem:[#allocation33_spill] sm:$0xff] }
 0x31a   : > { %v1439_v31 = vpop.eup %1438  ;;  %1458 = vpow2.f32 %v1000_v39  ;;  %v2599_v63 = vsub.f32 %v2598_v45, %v2046_v62  ;;  %v2603_v47 = vsub.f32 %v2602_v19, %v2046_v62 }
 0x31b   : > { %v1441_v53 = vpop.eup %1440  ;;  %1460 = vpow2.f32 %v1002_v11 }
 0x31c   : > { %v1443_v51 = vpop.eup %1442  ;;  %1462 = vpow2.f32 %v1004_v49  ;;  %1098 = vmatpush1.bf16.msra.mxu0 %v1058_v15  ;;  %v1064_v38 = vpack.c.bf16 %v1441_v53, %v1437_v7  ;;  %v1030_v10 = vmul.f32 1.442695, %v2603_v47  ;;  %v2605_v49 = vsub.f32 %v2604_v24, %v2083_v30 }
 0x31d   : > { %v1445_v2 = vpop.eup %1444  ;;  %1464 = vpow2.f32 %v1006_v23  ;;  %1099 = vmatprep.subr.bf16.mxu0 %v1061_v58  ;;  %v1065_v48 = vpack.c.bf16 %v1443_v51, %v1439_v31  ;;  %v2601_v58 = vsub.f32 %v2600_v46, %v2083_v30  ;;  %v2606_v23 = vld [vmem:[#allocation36_spill] sm:$0xff]  ;;  %v1512_v46 = vld [vmem:[#allocation3] sm:$0x77] }
 0x31e   : > { %v1447_v41 = vpop.eup %1446  ;;  %1466 = vpow2.f32 %v1008_v55  ;;  %v1032_v7 = vmul.f32 1.442695, %v2605_v49  ;;  %v1036_v55 = vmul.f32 1.442695, %v2608_v13  ;;  %v1136_v49 = vlaneseq }
 0x31f   : > { %v1449_v33 = vpop.eup %1448  ;;  %1468 = vpow2.f32 %v1010_v9  ;;  %v1028_v3 = vmul.f32 1.442695, %v2601_v58  ;;  %v2609_v9 = vld [vmem:[#allocation38_spill] sm:$0xff]  ;;  %v1294_v58 = vcombine.low %v1512_v46, %v1512_v46  ;;  %v1147_v13 = vstv %s1146_s20 }
 0x320   : > { %v1451_v15 = vpop.eup %1450  ;;  %1470 = vpow2.f32 %v1012_v17  ;;  %1100 = vmatpush1.bf16.msra.mxu0 %v1060_v50  ;;  %v1066_v26 = vpack.c.bf16 %v1449_v33, %v1445_v2  ;;  %v1026_v50 = vmul.f32 1.442695, %v2599_v63  ;;  %v2610_v51 = vsub.f32 %v2609_v9, %v2046_v62 }
 0x321   : > { %v1453_v61 = vpop.eup %1452  ;;  %1472 = vpow2.f32 %v1014_v18  ;;  %1101 = vmatprep.subr.bf16.mxu0 %v1063_v32  ;;  %v1067_v8 = vpack.c.bf16 %v1451_v15, %v1447_v41  ;;  %v2607_v32 = vsub.f32 %v2606_v23, %v2046_v62  ;;  %v2611_v2 = vsub.f32 %v2548_v52, %v2083_v30  ;;  %v2612_v18 = vld [vmem:[#allocation40_spill] sm:$0xff] }
 0x322   : > { %v1455_v34 = vpop.eup %1454  ;;  %1474 = vpow2.f32 %v1016_v60  ;;  %v1038_v35 = vmul.f32 1.442695, %v2610_v51  ;;  %v2613_v44 = vsub.f32 %v2612_v18, %v2046_v62  ;;  %v2614_v41 = vsub.f32 %v2043_v14, %v2083_v30 }
 0x323   : > { %v1457_v42 = vpop.eup %1456  ;;  %1476 = vpow2.f32 %v1018_v28  ;;  %v1040_v43 = vmul.f32 1.442695, %v2611_v2 }
 0x324   : > { %v1459_v54 = vpop.eup %1458  ;;  %1478 = vpow2.f32 %v1020_v36  ;;  %1102 = vmatpush1.bf16.msra.mxu0 %v1062_v27  ;;  %v1068_v16 = vpack.c.bf16 %v1457_v42, %v1453_v61  ;;  %v1034_v27 = vmul.f32 1.442695, %v2607_v32  ;;  %v1044_v57 = vmul.f32 1.442695, %v2614_v41 }
 0x325   : > { %v1461_v39 = vpop.eup %1460  ;;  %1480 = vpow2.f32 %v1022_v12  ;;  %1103 = vmatprep.subr.bf16.mxu0 %v1065_v48  ;;  %v1069_v11 = vpack.c.bf16 %v1459_v54, %v1455_v34 }
 0x326   : > { %v1463_v20 = vpop.eup %1462  ;;  %1482 = vpow2.f32 %v1024_v0 }
 0x327   : > { %v1465_v59 = vpop.eup %1464  ;;  %1484 = vpow2.f32 %v1026_v50 }
 0x328   : > { %v1467_v31 = vpop.eup %1466  ;;  %1486 = vpow2.f32 %v1028_v3  ;;  %1104 = vmatpush1.bf16.msra.mxu0 %v1064_v38  ;;  %v1070_v53 = vpack.c.bf16 %v1465_v59, %v1461_v39  ;;  %v1042_v38 = vmul.f32 1.442695, %v2613_v44  ;;  %v852_v3 = vsub.f32 -inf, %v2046_v62 }
 0x329   : > { %v1469_v6 = vpop.eup %1468  ;;  %1488 = vpow2.f32 %v1030_v10  ;;  %1105 = vmatprep.subr.bf16.mxu0 %v1067_v8  ;;  %v1071_v40 = vpack.c.bf16 %v1467_v31, %v1463_v20  ;;  %v1137_v62 = vshrl.u32 %v1136_v49, 7 }
 0x32a   : > { %v1471_v17 = vpop.eup %1470  ;;  %1490 = vpow2.f32 %v1032_v7  ;;  %v854_v39 = vmul.f32 1.442695, %v852_v3 }
 0x32b   : > { %v1473_v37 = vpop.eup %1472  ;;  %1492 = vpow2.f32 %v1034_v27 }
 0x32c   : > { %v1475_v48 = vpop.eup %1474  ;;  %1494 = vpow2.f32 %v1036_v55  ;;  %1106 = vmatpush1.bf16.msra.mxu0 %v1066_v26  ;;  %v1072_v60 = vpack.c.bf16 %v1473_v37, %v1469_v6 }
 0x32d   : > { %v1477_v33 = vpop.eup %1476  ;;  %1496 = vpow2.f32 %v1038_v35  ;;  %1107 = vmatprep.subr.bf16.mxu0 %v1069_v11  ;;  %v1073_v29 = vpack.c.bf16 %v1475_v48, %v1471_v17  ;;  %v1513_v35 = vld [vmem:[%s1788_s22] sm:$0xff]  ;;  %s1158_s22 = scalar_lea.sflag [#allocation8], %s1782_s29 }
 0x32e   : > { %v1479_v52 = vpop.eup %1478  ;;  %1498 = vpow2.f32 %v1040_v43  ;;  %v2615_v17 = vld [vmem:[#allocation12_spill] sm:$0xff] }
 0x32f   : > { %v1481_v22 = vpop.eup %1480  ;;  %1500 = vpow2.f32 %v1042_v38 }
 0x330   : > { %v1483_v28 = vpop.eup %1482  ;;  %1502 = vpow2.f32 %v1044_v57  ;;  %1108 = vmatpush1.bf16.msra.mxu0 %v1068_v16  ;;  %v1074_v15 = vpack.c.bf16 %v1481_v22, %v1477_v33  ;;  %v853_v16 = vsub.f32 -inf, %v2083_v30  ;;  %v1138_v30 = vsub.s32 4, %v1137_v62 }
 0x331   : > { %v1485_v5 = vpop.eup %1484  ;;  %1109 = vmatprep.subr.bf16.mxu0 %v1071_v40  ;;  %v1075_v36 = vpack.c.bf16 %v1483_v28, %v1479_v52  ;;  %1504 = vpow2.f32 %v854_v39 }
 0x332   : > { %v1487_v61 = vpop.eup %1486  ;;  %v856_v19 = vmul.f32 1.442695, %v853_v16 }
 0x333   : > { %v1489_v14 = vpop.eup %1488 }
 0x334   : > { %v1491_v4 = vpop.eup %1490  ;;  %1110 = vmatpush1.bf16.msra.mxu0 %v1070_v53  ;;  %v1076_v26 = vpack.c.bf16 %v1489_v14, %v1485_v5  ;;  %1506 = vpow2.f32 %v856_v19 }
 0x335   : > { %v1493_v1 = vpop.eup %1492  ;;  %1111 = vmatprep.subr.bf16.mxu0 %v1073_v29  ;;  %v1077_v12 = vpack.c.bf16 %v1491_v4, %v1487_v61 }
 0x336   : > { %v1495_v8 = vpop.eup %1494 }
 0x337   : > { %v1497_v34 = vpop.eup %1496 }
 0x338   : > { %v1499_v56 = vpop.eup %1498  ;;  %1112 = vmatpush1.bf16.msra.mxu0 %v1072_v60  ;;  %v1078_v0 = vpack.c.bf16 %v1497_v34, %v1493_v1 }
 0x339   : > { %v1501_v42 = vpop.eup %1500  ;;  %1113 = vmatprep.subr.bf16.mxu0 %v1075_v36  ;;  %v1079_v45 = vpack.c.bf16 %v1499_v56, %v1495_v8 }
 0x33a   : > { %v1503_v63 = vpop.eup %1502  ;;  %v1080_v50 = vpack.c.bf16 %v2206_v21, %v1501_v42 }
 0x33b   : > { %v1081_v54 = vpack.c.bf16 %v2208_v25, %v1503_v63  ;;  %v1505_v21 = vpop.eup %1504 }
 0x33c   : > { %1114 = vmatpush1.bf16.msra.mxu0 %v1074_v15  ;;  %v1130_v47 = vmul.f32 0.0, %v1505_v21 }
 0x33d   : > { %1115 = vmatprep.subr.bf16.mxu0 %v1077_v12 }
 0x33e   : > { %v1507_v25 = vpop.eup %1506 }
 0x33f   : > { %v1131_v11 = vmul.f32 0.0, %v1507_v25 }
 0x340   : > { %1116 = vmatpush1.bf16.msra.mxu0 %v1076_v26 }
 0x341   : > { %1117 = vmatprep.subr.bf16.mxu0 %v1079_v45 }
 0x344   : > { %1118 = vmatpush1.bf16.msra.mxu0 %v1078_v0 }
 0x345   : > { %1119 = vmatprep.subr.bf16.mxu0 %v1081_v54 }
 0x348   : > { %1120 = vmatpush1.bf16.msra.mxu0 %v1080_v50 }
 0x34b   : > { %1122 = vmatmul.mubr.bf16.vlgmr.msra.gmra.mrb[12].mxu0 %v1294_v58 }
 0x41e   : > { %v1123_v10 = vpop.f32.mrb[12].mxu0 }
 0x41f   : > { %v1132_v20 = vadd.f32 %v1130_v47, %v1123_v10  ;;  %v1125_v24 = vpop.f32.mrb[13].mxu0 }
 0x420   : > { %v1133_v7 = vadd.f32 %v1131_v11, %v1125_v24  ;;  %v1127_v59 = vpop.f32.mrb[14].mxu0 }
 0x421   : > { %1508 = vrcp.f32 %v1132_v20  ;;  %v1128_v23 = vpop.f32.mrb[15].mxu0 }
 0x422   : > { %1510 = vrcp.f32 %v1133_v7 }
 0x42b   : > { %v1509_v32 = vpop.eup %1508 }
 0x42c   : > { %v1511_v27 = vpop.eup %1510  ;;  %v1139_v31 = vrot.slane %v1509_v32, %v1138_v30 }
 0x42d   : > { %v1143_v55 = vrot.slane %v1511_v27, %v1138_v30 }
 0x42e   : > { %v1144_v53 = vmul.f32 %v1139_v31, %v1132_v20 }
 0x42f   : > { %v1145_v6 = vmul.f32 %v1143_v55, %v1133_v7 }
 0x430   : > { %v1148_v9 = vmul.f32 %v1147_v13, %v1144_v53 }
 0x431   : > { %v1149_v51 = vmul.f32 %v1147_v13, %v1145_v6 }
 0x432   : > { %v1150_v40 = vadd.f32 %v1513_v35, %v1148_v9 }
 0x433   : > { %v1151_v2 = vadd.f32 %v1149_v51, %v2615_v17 }
 0x435   : > { %v1154_v43 = vcombine.low %v1150_v40, %v1151_v2 }
 0x437   : > { %1156 = vst [vmem:[%s256_s19] sm:$0xff] %v1154_v43 }
 0x438   : > { %1557 = shalt.err (!%p1554_p6)
}
 0x439   : > { %s1558_s29 = scalar_lea.hbm %s2387_s8, 128  ;;  %s1562_s18 = scalar_lea.hbm %s2442_s6, 256 }
 0x43a   : > { %p1559_p4 = scmp.ne.s32.totalorder %s2387_s8, %s1558_s29  ;;  %p1563_p1 = scmp.lt.u32.totalorder %s2387_s8, %s2442_s6 }
 0x43b   : > { %p1564_p2 = scmp.lt.u32.totalorder %s1562_s18, %s1558_s29  ;;  %p1566_p8 = scmp.lt.u32.totalorder %s1558_s29, %s2387_s8 }
 0x43c   : > { %p1560_p10 = pnand %p1559_p4, %p2616_p9 }
 0x43d   : > { %p1565_p5 = por %p1564_p2, %p1563_p1 }
 0x43e   : > { %p1561_p12 = pneg %p1560_p10 }
 0x43f   : > { %p1567_p11 = por %p1566_p8, %p1565_p5 }
 0x441   : > { %p1568_p0 = pnand %p1567_p11, %p1561_p12 }
 0x443   : > { %1571 = shalt.err (!%p1568_p0)
}
 0x444   : > { %1306 = dma.vmem_to_hbm [thread:$0]  (%p2616_p9), %s2389_s21, 128, %s2387_s8, %s1158_s22  }
 0x445 PF: > { %s1186_s19 = sand.u32 1, %s1606_s23   ;;  %p2617_p7 = scmp.ne.s32.totalorder %s2496_s13, 0 }
 0x446   : > { %p2618_p13 = scmp.ge.s32.totalorder %s1626_s28, 2  ;;  %s1187_s10 = scalar_lea.sflag [#allocation8], %s1186_s19 }
 0x448   : > { %p1313_p3 = pnand %p2618_p13, %p2617_p7 }
 0x44a   : > { %1601 = dma.done.wait (!%p1313_p3), %s1187_s10, 128  }
 0x44b   : > { %1603 = vsyncadd (!%p1313_p3), %s1187_s10, 4294967168  ;;  %s23_s28 = sadd.s32 1, %s1626_s28   ;;  %s2619_s23 = smov %s1610_s24 }
 0x44c   : > { %p20_p6 = scmp.ge.s32.totalorder %s23_s28, 4   ;;  %s2620_s24 = smov %s1614_s25 }
 0x44d   : > { %s2621_s25 = smov %s1727_s12  ;;  %s2622_s26 = smov %s1622_s27 }
 0x44e   : > { %s2623_s27 = smov %s2625_s30  ;;  %22 = sbr.rel (!%p20_p6) target bundleno = 8 (0x8), region = 90 }
 0x455   :  { %1192 = vsyncpa [#allocation7], 1 }
 0x456   :  { %1194 = vsyncpa [#allocation7 + $0x1], 1 }
 0x457   :  { %1195 = vsyncpa [#allocation8], 1 }
 0x458   :  { %1197 = vsyncpa [#allocation8 + $0x1], 1 }

</bundles_post_ra>
